<compile_context>
chip_gen: v6e
topology: v6e:2x2x1
jax: 0.10.0
libtpu: 0.0.40
codegen_flags: <defaults>
</compile_context>

<pallas_src>
import functools
import math

import jax
import jax.numpy as jnp
from jax.experimental import pallas as pl
from jax.experimental.pallas import tpu as pltpu


def _round_up(n, m):
    return ((n + m - 1) // m) * m


def _cdiv(a, b):
    return -(-a // b)


def _baseline1_kernel(x_ref, w_ref, b_ref, q_ref, *, in_rows, out_cols):
    """x_ref: [TB, in_rows] (input dtype), w_ref: [4, P, P] (compute dtype),
    b_ref: [4, 1, P] (f32), q_ref: [TB, out_cols] (f32)."""
    cdt = w_ref.dtype
    h = x_ref[...].astype(cdt)                                   # in-kernel cast (VPU, free)

    # Layer 0: feature layer 0 — slice weight rows to the (padded) input width.
    y = jnp.dot(h, w_ref[0, :in_rows, :], preferred_element_type=jnp.float32)  # MXU, f32 acc
    y = jnp.maximum(y + b_ref[0], 0.0)                           # f32 bias + ReLU (VPU)
    h = y.astype(cdt)

    # Layers 1..2: feature layer 1, fused advantage/value hidden heads.
    for idx in (1, 2):
        y = jnp.dot(h, w_ref[idx], preferred_element_type=jnp.float32)
        y = jnp.maximum(y + b_ref[idx], 0.0)
        h = y.astype(cdt)

    # Layer 3: fused dueling output  q = value + advantage - advantage.mean(dim=1).
    # Static lane-slice of the weight -> matmul yields [TB, out_cols] directly.
    q = jnp.dot(h, w_ref[3, :, :out_cols], preferred_element_type=jnp.float32)
    q_ref[...] = (q + b_ref[3, :, :out_cols]).astype(q_ref.dtype)


def _pick_batch_tiling(bsz, in_pad, tile_b):
    """Adaptive batch tile: big tiles (few grid steps), low padding waste,
    VMEM-aware cap, and >=2 steps for moderate batches (v7x 2-TC sharding)."""
    bytes_per_row = in_pad * 4                       # x streamed in f32
    vmem_cap = max(16, (((8 << 20) // bytes_per_row) // 16) * 16)   # x tile <= ~8 MiB/buffer
    tile_b = max(16, min(tile_b, vmem_cap))
    n_steps = max(1, _cdiv(bsz, tile_b))
    if n_steps == 1 and bsz >= 512:
        n_steps = 2                                  # let v7x's two TensorCores split the batch
    tb = _round_up(_cdiv(bsz, n_steps), 16)          # 16: bf16 sublane-pack friendly
    return tb, n_steps, tb * n_steps


def baseline1_forward(x, w_packed, b_packed, out_dim, *, tile_b=4096):
    """x: [B, ...] arbitrary trailing dims; w_packed: [4, P, P]; b_packed: [4, 1, P]."""
    bsz = x.shape[0]
    P = w_packed.shape[-1]

    x2d = x.reshape(bsz, -1)                         # torch.flatten(x, start_dim=1); no cast here
    in_dim = x2d.shape[1]
    in_pad = _round_up(in_dim, 16)                   # align weight-row slice to bf16 sublane pack
    if in_pad != in_dim:
        x2d = jnp.pad(x2d, ((0, 0), (0, in_pad - in_dim)))   # zero cols hit zero weight rows

    tb, n_steps, b_pad = _pick_batch_tiling(bsz, in_pad, tile_b)
    if b_pad != bsz:
        x2d = jnp.pad(x2d, ((0, b_pad - bsz), (0, 0)))       # padded rows sliced off below

    kernel = functools.partial(_baseline1_kernel, in_rows=in_pad, out_cols=out_dim)

    flops = 2 * b_pad * (in_pad * P + 2 * P * P + P * out_dim)
    bytes_accessed = (
        b_pad * in_pad * x2d.dtype.itemsize
        + w_packed.size * w_packed.dtype.itemsize
        + b_packed.size * 4
        + b_pad * out_dim * 4
    )

    q = pl.pallas_call(
        kernel,
        out_shape=jax.ShapeDtypeStruct((b_pad, out_dim), jnp.float32),
        grid=(n_steps,),
        in_specs=[
            pl.BlockSpec((tb, in_pad), lambda i: (i, 0)),            # x: streamed / pipelined
            pl.BlockSpec(w_packed.shape, lambda i: (0, 0, 0)),       # weights: VMEM-resident
            pl.BlockSpec(b_packed.shape, lambda i: (0, 0, 0)),       # biases:  VMEM-resident
        ],
        out_specs=pl.BlockSpec((tb, out_dim), lambda i: (i, 0)),
        compiler_params=pltpu.CompilerParams(
            dimension_semantics=("parallel",),       # shard batch steps across TCs on v7x
        ),
        cost_estimate=pl.CostEstimate(
            flops=flops, transcendentals=0, bytes_accessed=bytes_accessed),
    )(x2d, w_packed, b_packed)
    return q[:bsz]


def init_params(key, in_dim, hidden, out_dim):
    """PyTorch-style init. Weights pre-transposed to [fan_in, fan_out]; biases [1, fan_out]."""
    def linear(key, fan_in, fan_out):
        kw, kb = jax.random.split(key)
        bound = 1.0 / math.sqrt(fan_in)
        w = jax.random.uniform(kw, (fan_in, fan_out), jnp.float32, -bound, bound)
        bias = jax.random.uniform(kb, (1, fan_out), jnp.float32, -bound, bound)
        return w, bias

    keys = jax.random.split(key, 6)
    p = {}
    p["wf0"], p["bf0"] = linear(keys[0], in_dim, hidden)
    p["wf1"], p["bf1"] = linear(keys[1], hidden, hidden)
    p["wa0"], p["ba0"] = linear(keys[2], hidden, hidden)
    p["wao"], p["bao"] = linear(keys[3], hidden, out_dim)
    p["wv0"], p["bv0"] = linear(keys[4], hidden, hidden)
    p["wvo"], p["bvo"] = linear(keys[5], hidden, 1)
    return p


def pack_params(p, in_dim, hidden, out_dim, compute_dtype=jnp.bfloat16):
    """Fuse the dueling heads (exact algebra) and stack all 4 layers into two padded buffers.

    Returns (w_packed [4, P, P] compute_dtype, b_packed [4, 1, P] float32), P a multiple of 128.
    """
    # --- exact algebraic fusion of the dueling heads ---
    # [a | v] = relu(r @ [wa0 | wv0] + [ba0 | bv0])
    w_h = jnp.concatenate([p["wa0"], p["wv0"]], axis=1)            # [hid, 2*hid]
    b_h = jnp.concatenate([p["ba0"], p["bv0"]], axis=1)            # [1, 2*hid]
    # q = val + adv - adv.mean(1)  ==  [a|v] @ [wao - colmean(wao); tile(wvo)] + b_out
    wao_c = p["wao"] - jnp.mean(p["wao"], axis=1, keepdims=True)
    w_out = jnp.concatenate([wao_c, jnp.tile(p["wvo"], (1, out_dim))], axis=0)
    b_out = (p["bao"] - jnp.mean(p["bao"], axis=1, keepdims=True)) + p["bvo"]

    layers = [
        (p["wf0"], p["bf0"]),
        (p["wf1"], p["bf1"]),
        (w_h, b_h),
        (w_out, b_out),
    ]
    # Lane-width padding: full 128-wide vregs / MXU passes; weights are tiny so zeros are free.
    P = _round_up(max(_round_up(in_dim, 16), 2 * hidden, out_dim), 128)

    def pad_w(w):
        return jnp.zeros((P, P), jnp.float32).at[: w.shape[0], : w.shape[1]].set(w)

    def pad_b(b):
        return jnp.zeros((1, P), jnp.float32).at[:, : b.shape[1]].set(b)

    w_packed = jnp.stack([pad_w(w) for w, _ in layers]).astype(compute_dtype)
    b_packed = jnp.stack([pad_b(b) for _, b in layers]).astype(jnp.float32)
    return w_packed, b_packed


def _reference_forward(x, p):
    """Pure-JAX f32 reference mirroring the PyTorch module exactly."""
    b = x.shape[0]
    h = x.reshape(b, -1).astype(jnp.float32)
    r = jnp.maximum(h @ p["wf0"] + p["bf0"], 0.0)
    r = jnp.maximum(r @ p["wf1"] + p["bf1"], 0.0)
    a = jnp.maximum(r @ p["wa0"] + p["ba0"], 0.0)
    adv = a @ p["wao"] + p["bao"]
    v = jnp.maximum(r @ p["wv0"] + p["bv0"], 0.0)
    val = v @ p["wvo"] + p["bvo"]
    return val + adv - jnp.mean(adv, axis=1, keepdims=True)


if __name__ == "__main__":
    key = jax.random.PRNGKey(0)
    kx, kp, kx2 = jax.random.split(key, 3)

    batch, c, s = 2, 4, 16            # x: [2, 4, 16] -> flattened in_dim = 64
    in_dim, hidden, out_dim = c * s, 32, 8

    x = jax.random.normal(kx, (batch, c, s), jnp.float32)
    params = init_params(kp, in_dim, hidden, out_dim)
    q_ref = _reference_forward(x, params)

    # 1) f32 compute path: exact forward-pass semantics check vs the module math.
    w32, b32 = pack_params(params, in_dim, hidden, out_dim, jnp.float32)
    q32 = jax.block_until_ready(baseline1_forward(x, w32, b32, out_dim))
    assert q32.shape == (batch, out_dim)
    assert jnp.allclose(q32, q_ref, atol=1e-4, rtol=1e-4), "f32 mismatch vs reference"

    # 2) bf16 fast path (default): bf16 MXU operands, f32 accumulation / bias / ReLU.
    wbf, bbf = pack_params(params, in_dim, hidden, out_dim, jnp.bfloat16)
    qbf = jax.block_until_ready(baseline1_forward(x, wbf, bbf, out_dim))
    assert qbf.shape == (batch, out_dim)
    assert jnp.allclose(qbf, q_ref, atol=5e-2, rtol=5e-2), "bf16 mismatch vs reference"

    # 3) moderate, non-multiple-of-16 batch: exercises multi-step grid + batch padding/slicing.
    xb = jax.random.normal(kx2, (600, c, s), jnp.float32)
    qb_ref = _reference_forward(xb, params)
    qb = jax.block_until_ready(baseline1_forward(xb, w32, b32, out_dim))
    assert qb.shape == (600, out_dim)
    assert jnp.allclose(qb, qb_ref, atol=1e-4, rtol=1e-4), "f32 multi-step mismatch vs reference"

    print("KERNEL_OK")
</pallas_src>

<mosaic_0001>
module attributes {stable_mosaic.version = 11 : i64} {
  func.func @_baseline1_kernel(%arg0: i32, %arg1: memref<16x64xf32, #tpu.memory_space<vmem>>, %arg2: memref<4x128x128xf32, #tpu.memory_space<vmem>>, %arg3: memref<4x1x128xf32, #tpu.memory_space<vmem>>, %arg4: memref<16x8xf32, #tpu.memory_space<vmem>>) attributes {dimension_semantics = [#tpu.dimension_semantics<parallel>], iteration_bounds = array<i64: 1>, scalar_prefetch = 0 : i64, scratch_operands = 0 : i64, tpu.core_type = #tpu.core_type<tc>, window_params = [{transform_indices = @transform_0, window_bounds = array<i64: 16, 64>}, {pipeline_mode = #tpu.pipeline_mode<synchronous>, transform_indices = @transform_1, window_bounds = array<i64: 4, 128, 128>}, {pipeline_mode = #tpu.pipeline_mode<synchronous>, transform_indices = @transform_2, window_bounds = array<i64: 4, 1, 128>}, {transform_indices = @transform_3, window_bounds = array<i64: 16, 8>}]} {
    %c0 = arith.constant 0 : index
    %c0_0 = arith.constant 0 : index
    %0 = vector.load %arg1[%c0, %c0_0] : memref<16x64xf32, #tpu.memory_space<vmem>>, vector<16x64xf32>
    %c0_1 = arith.constant 0 : index
    %c0_2 = arith.constant 0 : index
    %c0_3 = arith.constant 0 : index
    %1 = vector.load %arg2[%c0_1, %c0_2, %c0_3] : memref<4x128x128xf32, #tpu.memory_space<vmem>>, vector<1x64x128xf32>
    %2 = vector.shape_cast %1 : vector<1x64x128xf32> to vector<64x128xf32>
    %cst = arith.constant dense<0.000000e+00> : vector<16x128xf32>
    %3 = tpu.matmul %0, %2, %cst {dimension_numbers = #tpu.dot_dimension_numbers<[1], [0], [0], [1], [0, 0, 1, 1], [], []>} : vector<16x64xf32>, vector<64x128xf32>, vector<16x128xf32> -> vector<16x128xf32>
    %c0_4 = arith.constant 0 : index
    %c0_5 = arith.constant 0 : index
    %c0_6 = arith.constant 0 : index
    %4 = vector.load %arg3[%c0_4, %c0_5, %c0_6] : memref<4x1x128xf32, #tpu.memory_space<vmem>>, vector<1x1x128xf32>
    %5 = vector.shape_cast %4 : vector<1x1x128xf32> to vector<1x128xf32>
    %6 = vector.broadcast %5 : vector<1x128xf32> to vector<16x128xf32>
    %7 = arith.addf %3, %6 : vector<16x128xf32>
    %cst_7 = arith.constant 0.000000e+00 : f32
    %8 = vector.broadcast %cst_7 : f32 to vector<16x128xf32>
    %9 = arith.maximumf %7, %8 : vector<16x128xf32>
    %c1 = arith.constant 1 : index
    %c0_8 = arith.constant 0 : index
    %c0_9 = arith.constant 0 : index
    %10 = vector.load %arg2[%c1, %c0_8, %c0_9] : memref<4x128x128xf32, #tpu.memory_space<vmem>>, vector<1x128x128xf32>
    %11 = vector.shape_cast %10 : vector<1x128x128xf32> to vector<128x128xf32>
    %cst_10 = arith.constant dense<0.000000e+00> : vector<16x128xf32>
    %12 = tpu.matmul %9, %11, %cst_10 {dimension_numbers = #tpu.dot_dimension_numbers<[1], [0], [0], [1], [0, 0, 1, 1], [], []>} : vector<16x128xf32>, vector<128x128xf32>, vector<16x128xf32> -> vector<16x128xf32>
    %c1_11 = arith.constant 1 : index
    %c0_12 = arith.constant 0 : index
    %c0_13 = arith.constant 0 : index
    %13 = vector.load %arg3[%c1_11, %c0_12, %c0_13] : memref<4x1x128xf32, #tpu.memory_space<vmem>>, vector<1x1x128xf32>
    %14 = vector.shape_cast %13 : vector<1x1x128xf32> to vector<1x128xf32>
    %15 = vector.broadcast %14 : vector<1x128xf32> to vector<16x128xf32>
    %16 = arith.addf %12, %15 : vector<16x128xf32>
    %cst_14 = arith.constant 0.000000e+00 : f32
    %17 = vector.broadcast %cst_14 : f32 to vector<16x128xf32>
    %18 = arith.maximumf %16, %17 : vector<16x128xf32>
    %c2 = arith.constant 2 : index
    %c0_15 = arith.constant 0 : index
    %c0_16 = arith.constant 0 : index
    %19 = vector.load %arg2[%c2, %c0_15, %c0_16] : memref<4x128x128xf32, #tpu.memory_space<vmem>>, vector<1x128x128xf32>
    %20 = vector.shape_cast %19 : vector<1x128x128xf32> to vector<128x128xf32>
    %cst_17 = arith.constant dense<0.000000e+00> : vector<16x128xf32>
    %21 = tpu.matmul %18, %20, %cst_17 {dimension_numbers = #tpu.dot_dimension_numbers<[1], [0], [0], [1], [0, 0, 1, 1], [], []>} : vector<16x128xf32>, vector<128x128xf32>, vector<16x128xf32> -> vector<16x128xf32>
    %c2_18 = arith.constant 2 : index
    %c0_19 = arith.constant 0 : index
    %c0_20 = arith.constant 0 : index
    %22 = vector.load %arg3[%c2_18, %c0_19, %c0_20] : memref<4x1x128xf32, #tpu.memory_space<vmem>>, vector<1x1x128xf32>
    %23 = vector.shape_cast %22 : vector<1x1x128xf32> to vector<1x128xf32>
    %24 = vector.broadcast %23 : vector<1x128xf32> to vector<16x128xf32>
    %25 = arith.addf %21, %24 : vector<16x128xf32>
    %cst_21 = arith.constant 0.000000e+00 : f32
    %26 = vector.broadcast %cst_21 : f32 to vector<16x128xf32>
    %27 = arith.maximumf %25, %26 : vector<16x128xf32>
    %c3 = arith.constant 3 : index
    %c0_22 = arith.constant 0 : index
    %c0_23 = arith.constant 0 : index
    %28 = vector.load %arg2[%c3, %c0_22, %c0_23] : memref<4x128x128xf32, #tpu.memory_space<vmem>>, vector<1x128x8xf32>
    %29 = vector.shape_cast %28 : vector<1x128x8xf32> to vector<128x8xf32>
    %cst_24 = arith.constant dense<0.000000e+00> : vector<16x8xf32>
    %30 = tpu.matmul %27, %29, %cst_24 {dimension_numbers = #tpu.dot_dimension_numbers<[1], [0], [0], [1], [0, 0, 1, 1], [], []>} : vector<16x128xf32>, vector<128x8xf32>, vector<16x8xf32> -> vector<16x8xf32>
    %c3_25 = arith.constant 3 : index
    %c0_26 = arith.constant 0 : index
    %c0_27 = arith.constant 0 : index
    %31 = vector.load %arg3[%c3_25, %c0_26, %c0_27] : memref<4x1x128xf32, #tpu.memory_space<vmem>>, vector<1x1x8xf32>
    %32 = vector.shape_cast %31 : vector<1x1x8xf32> to vector<1x8xf32>
    %33 = vector.broadcast %32 : vector<1x8xf32> to vector<16x8xf32>
    %34 = arith.addf %30, %33 : vector<16x8xf32>
    %c0_28 = arith.constant 0 : index
    %c0_29 = arith.constant 0 : index
    %35 = vector.load %arg4[%c0_28, %c0_29] : memref<16x8xf32, #tpu.memory_space<vmem>>, vector<16x8xf32>
    tpu.vector_store %arg4[%c0_28, %c0_29], %34 {strides = array<i32>} : memref<16x8xf32, #tpu.memory_space<vmem>>, vector<16x8xf32>,
    return
  }
  func.func @transform_0(%arg0: i32) -> (i32, i32) {
    %c0_i32 = arith.constant 0 : i32
    %c0_i32_0 = arith.constant 0 : i32
    return %arg0, %c0_i32 : i32, i32
  }
  func.func @transform_1(%arg0: i32) -> (i32, i32, i32) {
    %c0_i32 = arith.constant 0 : i32
    %c0_i32_0 = arith.constant 0 : i32
    %c0_i32_1 = arith.constant 0 : i32
    %c0_i32_2 = arith.constant 0 : i32
    return %c0_i32, %c0_i32_0, %c0_i32_1 : i32, i32, i32
  }
  func.func @transform_2(%arg0: i32) -> (i32, i32, i32) {
    %c0_i32 = arith.constant 0 : i32
    %c0_i32_0 = arith.constant 0 : i32
    %c0_i32_1 = arith.constant 0 : i32
    %c0_i32_2 = arith.constant 0 : i32
    return %c0_i32, %c0_i32_0, %c0_i32_1 : i32, i32, i32
  }
  func.func @transform_3(%arg0: i32) -> (i32, i32) {
    %c0_i32 = arith.constant 0 : i32
    %c0_i32_0 = arith.constant 0 : i32
    return %arg0, %c0_i32 : i32, i32
  }
}

</mosaic_0001>

<bundles_post_ra>
// kernel: tpu_custom_call.1
= control target key start
LH: loop header
LB: loop body
LE: loop exit
PB: predicated region body
PF: predicated region fallthrough
CT: control target
= control target key end

     0   :  { %8 = vsyncpa [#allocation3], 0  ;;  %s778_s0 = inlined_call_operand.hbm [shape: f32[16,64], index: 0, kind: input, shape index: {}]   ;;  %s779_s1 = inlined_call_operand.hbm [shape: f32[4,128,128], index: 1, kind: input, shape index: {}]   ;;  %s780_s2 = inlined_call_operand.hbm [shape: f32[4,1,128], index: 2, kind: input, shape index: {}]   ;;  %s781_s3 = inlined_call_operand.vmem [shape: f32[16,8], index: 3, kind: output, shape index: {}]  }
   0x1   :  { %9 = vsyncpa [#allocation5], 0  ;;  %s734_s12 = smov [#allocation4]   ;;  %s735_s14 = smov [#allocation2]  }
   0x2   :  { %s27_s13 = sshll.u32 %s734_s12, 4  ;;  %s15_s15 = sshll.u32 %s735_s14, 4  ;;  %s28_s13 = int_to_ptr.vmem [resolvable:$true] %s27_s13  ;;  %s16_s15 = int_to_ptr.vmem [resolvable:$true] %s15_s15 }
   0x3   :  { %s678_s16 = scalar_lea.vmem %s28_s13, 8192  ;;  %p683_p1 = scmp.lt.s32.totalorder %s28_s13, %s28_s13 }
   0x4   :  { %p679_p0 = scmp.ne.s32.totalorder %s28_s13, %s678_s16  ;;  %p684_p2 = scmp.lt.s32.totalorder %s678_s16, %s678_s16 }
   0x6   :  { %p685_p3 = por %p684_p2, %p683_p1 }
   0x8   :  { %p686_p4 = pnand %p685_p3, %p679_p0 }
   0xa   :  { %689 = shalt.err (!%p686_p4)
}
   0xb   :  { %s736_s17 = smov 128   ;;  %s737_s18 = smov 8  }
   0xc   :  { %33 = dma.hbm_to_vmem [thread:$0]  %s779_s1, 8192, %s28_s13, [#allocation5], %s736_s17, %s736_s17, %s737_s18  }
   0xd   :  { %s698_s21 = scalar_lea.vmem %s16_s15, 256  ;;  %p703_p6 = scmp.lt.s32.totalorder %s16_s15, %s16_s15 }
   0xe   :  { %p699_p5 = scmp.ne.s32.totalorder %s16_s15, %s698_s21  ;;  %p704_p7 = scmp.lt.s32.totalorder %s698_s21, %s698_s21 }
  0x10   :  { %p705_p8 = por %p704_p7, %p703_p6 }
  0x12   :  { %p706_p9 = pnand %p705_p8, %p699_p5 }
  0x14   :  { %709 = shalt.err (!%p706_p9)
}
  0x15   :  { %21 = dma.hbm_to_vmem [thread:$0]  %s778_s0, 256, %s16_s15, [#allocation3], %s736_s17, %s736_s17, %s737_s18  }
  0x16   :  { %s738_s24 = smov [#allocation6]  }
  0x17   :  { %s39_s25 = sshll.u32 %s738_s24, 4  ;;  %s40_s25 = int_to_ptr.vmem [resolvable:$true] %s39_s25 }
  0x18   :  { %s718_s26 = scalar_lea.vmem %s40_s25, 64  ;;  %p723_p11 = scmp.lt.s32.totalorder %s40_s25, %s40_s25 }
  0x19   :  { %p719_p10 = scmp.ne.s32.totalorder %s40_s25, %s718_s26  ;;  %p724_p12 = scmp.lt.s32.totalorder %s718_s26, %s718_s26 }
  0x1b   :  { %p725_p13 = por %p724_p12, %p723_p11 }
  0x1d   :  { %p726_p0 = pnand %p725_p13, %p719_p10 }
  0x1f   :  { %729 = shalt.err (!%p726_p0)
}
  0x20   :  { %s739_s1 = smov 16   ;;  %s740_s27 = smov 1  }
  0x21   :  { %45 = dma.hbm_to_vmem [thread:$0]  %s780_s2, 64, %s40_s25, [#allocation5], %s739_s1, %s739_s1, %s740_s27  }
  0x22   :  { %730 = dma.done.wait [#allocation3], 256  }
  0x23   :  { %731 = vsyncadd [#allocation3], 4294967040 }
  0x24   :  { %732 = dma.done.wait [#allocation5], 8256  }
  0x25   :  { %733 = vsyncadd [#allocation5], 4294959040  ;;  %v64_v0 = vld [vmem:[#allocation4 + $0x38] sm:$0xff]  ;;  %v63_v1 = vld [vmem:[#allocation4 + $0x30] sm:$0xff]  ;;  %vm72_vm0 = vcmask 523264   ;;  %vm460_vm1 = vcmask 64512  }
  0x26   :  { %539 = vmatprep.subr.mxu0 %v64_v0  ;;  %v62_v2 = vld [vmem:[#allocation4 + $0x28] sm:$0xff]  ;;  %v55_v3 = vld [vmem:[#allocation2] sm:$0xff]  ;;  %v172_v4 = vld [vmem:[#allocation4 + $0xf8] sm:$0xff] }
  0x27   :  { %540 = vmatpush3.msra.mxu0 %v64_v0  ;;  %555 = vmatprep.mubr.msk.f32.mxu0 %vm72_vm0, %v55_v3  ;;  %v171_v5 = vld [vmem:[#allocation4 + $0xf0] sm:$0xff]  ;;  %v61_v6 = vld [vmem:[#allocation4 + $0x20] sm:$0xff]  ;;  %v170_v7 = vld [vmem:[#allocation4 + $0xe8] sm:$0xff] }
  0x28   :  { %541 = vmatprep.subr.mxu0 %v63_v1  ;;  %558 = vmatprep.subr.mxu1 %v172_v4  ;;  %v60_v8 = vld [vmem:[#allocation4 + $0x18] sm:$0xff]  ;;  %v169_v9 = vld [vmem:[#allocation4 + $0xe0] sm:$0xff]  ;;  %v59_v10 = vld [vmem:[#allocation4 + $0x10] sm:$0xff] }
  0x29   :  { %542 = vmatpush3.msra.mxu0 %v63_v1  ;;  %559 = vmatpush3.msra.mxu1 %v172_v4  ;;  %v168_v11 = vld [vmem:[#allocation4 + $0xd8] sm:$0xff]  ;;  %v58_v12 = vld [vmem:[#allocation4 + $0x8] sm:$0xff]  ;;  %v167_v13 = vld [vmem:[#allocation4 + $0xd0] sm:$0xff] }
  0x2a   :  { %543 = vmatprep.subr.mxu0 %v62_v2  ;;  %560 = vmatprep.subr.mxu1 %v171_v5  ;;  %v57_v14 = vld [vmem:[#allocation4] sm:$0xff]  ;;  %v166_v15 = vld [vmem:[#allocation4 + $0xc8] sm:$0xff]  ;;  %v56_v16 = vld [vmem:[#allocation2 + $0x8] sm:$0xff] }
  0x2b   :  { %544 = vmatpush3.msra.mxu0 %v62_v2  ;;  %561 = vmatpush3.msra.mxu1 %v171_v5  ;;  %v165_v17 = vld [vmem:[#allocation4 + $0xc0] sm:$0xff]  ;;  %v164_v18 = vld [vmem:[#allocation4 + $0xb8] sm:$0xff]  ;;  %v163_v19 = vld [vmem:[#allocation4 + $0xb0] sm:$0xff] }
  0x2c   :  { %545 = vmatprep.subr.mxu0 %v61_v6  ;;  %562 = vmatprep.subr.mxu1 %v170_v7  ;;  %v162_v20 = vld [vmem:[#allocation4 + $0xa8] sm:$0xff]  ;;  %v161_v21 = vld [vmem:[#allocation4 + $0xa0] sm:$0xff]  ;;  %v160_v22 = vld [vmem:[#allocation4 + $0x98] sm:$0xff] }
  0x2d   :  { %546 = vmatpush3.msra.mxu0 %v61_v6  ;;  %563 = vmatpush3.msra.mxu1 %v170_v7  ;;  %v159_v23 = vld [vmem:[#allocation4 + $0x90] sm:$0xff]  ;;  %v158_v24 = vld [vmem:[#allocation4 + $0x88] sm:$0xff]  ;;  %v157_v25 = vld [vmem:[#allocation4 + $0x80] sm:$0xff] }
  0x2e   :  { %547 = vmatprep.subr.mxu0 %v60_v8  ;;  %564 = vmatprep.subr.mxu1 %v169_v9  ;;  %v274_v26 = vld [vmem:[#allocation4 + $0x178] sm:$0xff]  ;;  %v273_v27 = vld [vmem:[#allocation4 + $0x170] sm:$0xff]  ;;  %v272_v28 = vld [vmem:[#allocation4 + $0x168] sm:$0xff] }
  0x2f   :  { %548 = vmatpush3.msra.mxu0 %v60_v8  ;;  %565 = vmatpush3.msra.mxu1 %v169_v9  ;;  %v271_v29 = vld [vmem:[#allocation4 + $0x160] sm:$0xff]  ;;  %v270_v30 = vld [vmem:[#allocation4 + $0x158] sm:$0xff]  ;;  %v269_v31 = vld [vmem:[#allocation4 + $0x150] sm:$0xff] }
  0x30   :  { %549 = vmatprep.subr.mxu0 %v59_v10  ;;  %566 = vmatprep.subr.mxu1 %v168_v11  ;;  %v268_v32 = vld [vmem:[#allocation4 + $0x148] sm:$0xff]  ;;  %v267_v33 = vld [vmem:[#allocation4 + $0x140] sm:$0xff]  ;;  %v266_v34 = vld [vmem:[#allocation4 + $0x138] sm:$0xff] }
  0x31   :  { %550 = vmatpush3.msra.mxu0 %v59_v10  ;;  %567 = vmatpush3.msra.mxu1 %v168_v11  ;;  %v265_v35 = vld [vmem:[#allocation4 + $0x130] sm:$0xff]  ;;  %v264_v36 = vld [vmem:[#allocation4 + $0x128] sm:$0xff]  ;;  %v263_v37 = vld [vmem:[#allocation4 + $0x120] sm:$0xff] }
  0x32   :  { %551 = vmatprep.subr.mxu0 %v58_v12  ;;  %568 = vmatprep.subr.mxu1 %v167_v13  ;;  %v469_v38 = vld [vmem:[#allocation6] ss:$0 sm:$0xff]  ;;  %v262_v45 = vld [vmem:[#allocation4 + $0x118] sm:$0xff]  ;;  %v261_v46 = vld [vmem:[#allocation4 + $0x110] sm:$0xff] }
  0x33   :  { %552 = vmatpush3.msra.mxu0 %v58_v12  ;;  %569 = vmatpush3.msra.mxu1 %v167_v13  ;;  %v260_v47 = vld [vmem:[#allocation4 + $0x108] sm:$0xff]  ;;  %v259_v48 = vld [vmem:[#allocation4 + $0x100] sm:$0xff]  ;;  %v376_v49 = vld [vmem:[#allocation4 + $0x1f8] sm:$0xff] }
  0x34   :  { %553 = vmatprep.subr.mxu0 %v57_v14  ;;  %570 = vmatprep.subr.mxu1 %v166_v15  ;;  %v375_v50 = vld [vmem:[#allocation4 + $0x1f0] sm:$0xff]  ;;  %v374_v51 = vld [vmem:[#allocation4 + $0x1e8] sm:$0xff]  ;;  %v373_v52 = vld [vmem:[#allocation4 + $0x1e0] sm:$0xff] }
  0x35   :  { %554 = vmatpush3.msra.mxu0 %v57_v14  ;;  %571 = vmatpush3.msra.mxu1 %v166_v15  ;;  %v372_v53 = vld [vmem:[#allocation4 + $0x1d8] sm:$0xff]  ;;  %v371_v54 = vld [vmem:[#allocation4 + $0x1d0] sm:$0xff]  ;;  %v370_v55 = vld [vmem:[#allocation4 + $0x1c8] sm:$0xff] }
  0x36   :  { %556 = vmatmul.mubr.msk.f32.vlgmr.msra.gmra.mxu0 %vm72_vm0, %v56_v16  ;;  %572 = vmatprep.subr.mxu1 %v165_v17  ;;  %v369_v56 = vld [vmem:[#allocation4 + $0x1c0] sm:$0xff]  ;;  %v368_v57 = vld [vmem:[#allocation4 + $0x1b8] sm:$0xff]  ;;  %v367_v58 = vld [vmem:[#allocation4 + $0x1b0] sm:$0xff] }
  0x37   :  { %573 = vmatpush3.msra.mxu1 %v165_v17  ;;  %593 = vmatprep.subr.mxu0 %v274_v26  ;;  %v366_v59 = vld [vmem:[#allocation4 + $0x1a8] sm:$0xff]  ;;  %v365_v60 = vld [vmem:[#allocation4 + $0x1a0] sm:$0xff]  ;;  %v364_v4 = vld [vmem:[#allocation4 + $0x198] sm:$0xff] }
  0x38   :  { %574 = vmatprep.subr.mxu1 %v164_v18  ;;  %594 = vmatpush3.msra.mxu0 %v274_v26  ;;  %v472_v61 = vld [vmem:[#allocation6 + $0x1] ss:$0 sm:$0xff]  ;;  %v363_v5 = vld [vmem:[#allocation4 + $0x190] sm:$0xff]  ;;  %v362_v6 = vld [vmem:[#allocation4 + $0x188] sm:$0xff] }
  0x39   :  { %575 = vmatpush3.msra.mxu1 %v164_v18  ;;  %595 = vmatprep.subr.mxu0 %v273_v27  ;;  %v361_v7 = vld [vmem:[#allocation4 + $0x180] sm:$0xff] }
  0x3a   :  { %576 = vmatprep.subr.mxu1 %v163_v19  ;;  %596 = vmatpush3.msra.mxu0 %v273_v27  ;;  %v473_v8 = vld [vmem:[#allocation6 + $0x2] ss:$0 sm:$0xff]  ;;  %v474_v15 = vld [vmem:[#allocation6 + $0x3] ss:$0 sm:$0xff] }
  0x3b   :  { %577 = vmatpush3.msra.mxu1 %v163_v19  ;;  %597 = vmatprep.subr.mxu0 %v272_v28 }
  0x3c   :  { %578 = vmatprep.subr.mxu1 %v162_v20  ;;  %598 = vmatpush3.msra.mxu0 %v272_v28 }
  0x3d   :  { %579 = vmatpush3.msra.mxu1 %v162_v20  ;;  %599 = vmatprep.subr.mxu0 %v271_v29 }
  0x3e   :  { %580 = vmatprep.subr.mxu1 %v161_v21  ;;  %600 = vmatpush3.msra.mxu0 %v271_v29 }
  0x3f   :  { %581 = vmatpush3.msra.mxu1 %v161_v21  ;;  %601 = vmatprep.subr.mxu0 %v270_v30 }
  0x40   :  { %582 = vmatprep.subr.mxu1 %v160_v22  ;;  %602 = vmatpush3.msra.mxu0 %v270_v30 }
  0x41   :  { %583 = vmatpush3.msra.mxu1 %v160_v22  ;;  %603 = vmatprep.subr.mxu0 %v269_v31 }
  0x42   :  { %584 = vmatprep.subr.mxu1 %v159_v23  ;;  %604 = vmatpush3.msra.mxu0 %v269_v31 }
  0x43   :  { %585 = vmatpush3.msra.mxu1 %v159_v23  ;;  %605 = vmatprep.subr.mxu0 %v268_v32 }
  0x44   :  { %586 = vmatprep.subr.mxu1 %v158_v24  ;;  %606 = vmatpush3.msra.mxu0 %v268_v32 }
  0x45   :  { %587 = vmatpush3.msra.mxu1 %v158_v24  ;;  %607 = vmatprep.subr.mxu0 %v267_v33 }
  0x46   :  { %588 = vmatprep.subr.mxu1 %v157_v25  ;;  %608 = vmatpush3.msra.mxu0 %v267_v33 }
  0x47   :  { %589 = vmatpush3.msra.mxu1 %v157_v25  ;;  %609 = vmatprep.subr.mxu0 %v266_v34 }
  0x48   :  { %610 = vmatpush3.msra.mxu0 %v266_v34  ;;  %628 = vmatprep.subr.mxu1 %v376_v49 }
  0x49   :  { %611 = vmatprep.subr.mxu0 %v265_v35 }
  0x4a   :  { %612 = vmatpush3.msra.mxu0 %v265_v35 }
  0x4b   :  { %613 = vmatprep.subr.mxu0 %v264_v36 }
  0x4c   :  { %614 = vmatpush3.msra.mxu0 %v264_v36 }
  0x4d   :  { %615 = vmatprep.subr.mxu0 %v263_v37 }
  0x4e   :  { %616 = vmatpush3.msra.mxu0 %v263_v37 }
  0x4f   :  { %617 = vmatprep.subr.mxu0 %v262_v45 }
  0x50   :  { %618 = vmatpush3.msra.mxu0 %v262_v45 }
  0x51   :  { %619 = vmatprep.subr.mxu0 %v261_v46 }
  0x52   :  { %620 = vmatpush3.msra.mxu0 %v261_v46 }
  0x53   :  { %621 = vmatprep.subr.mxu0 %v260_v47 }
  0x54   :  { %622 = vmatpush3.msra.mxu0 %v260_v47 }
  0x55   :  { %623 = vmatprep.subr.mxu0 %v259_v48 }
  0x56   :  { %624 = vmatpush3.msra.mxu0 %v259_v48 }
  0xf6   :  { %v557_v39 = vpop.f32.mrf.mxu0 }
  0xf7   :  { %v151_v40 = vadd.f32 %v557_v39, %v469_v38 }
  0xf8   :  { %v145_v41 = vpop.f32.mrf.mxu0 }
  0xf9   :  { %v146_v42 = vadd.f32 %v469_v38, %v145_v41  ;;  %v155_v44 = vmax.f32 %v151_v40, 0.0 }
  0xfb   :  { %v154_v43 = vmax.f32 %v146_v42, 0.0 }
  0xfd   :  { %590 = vmatprep.mubr.f32.mxu1 %v154_v43 }
  0xfe   :  { %591 = vmatmul.mubr.f32.vlgmr.msra.gmra.mxu1 %v155_v44 }
  0xff   :  { %629 = vmatpush3.msra.mxu1 %v376_v49 }
 0x100   :  { %630 = vmatprep.subr.mxu1 %v375_v50 }
 0x101   :  { %631 = vmatpush3.msra.mxu1 %v375_v50 }
 0x102   :  { %632 = vmatprep.subr.mxu1 %v374_v51 }
 0x103   :  { %633 = vmatpush3.msra.mxu1 %v374_v51 }
 0x104   :  { %634 = vmatprep.subr.mxu1 %v373_v52 }
 0x105   :  { %635 = vmatpush3.msra.mxu1 %v373_v52 }
 0x106   :  { %636 = vmatprep.subr.mxu1 %v372_v53 }
 0x107   :  { %637 = vmatpush3.msra.mxu1 %v372_v53 }
 0x108   :  { %638 = vmatprep.subr.mxu1 %v371_v54 }
 0x109   :  { %639 = vmatpush3.msra.mxu1 %v371_v54 }
 0x10a   :  { %640 = vmatprep.subr.mxu1 %v370_v55 }
 0x10b   :  { %641 = vmatpush3.msra.mxu1 %v370_v55 }
 0x10c   :  { %642 = vmatprep.subr.mxu1 %v369_v56 }
 0x10d   :  { %643 = vmatpush3.msra.mxu1 %v369_v56 }
 0x10e   :  { %644 = vmatprep.subr.mxu1 %v368_v57 }
 0x10f   :  { %645 = vmatpush3.msra.mxu1 %v368_v57 }
 0x110   :  { %646 = vmatprep.subr.mxu1 %v367_v58 }
 0x111   :  { %647 = vmatpush3.msra.mxu1 %v367_v58 }
 0x112   :  { %648 = vmatprep.subr.mxu1 %v366_v59 }
 0x113   :  { %649 = vmatpush3.msra.mxu1 %v366_v59 }
 0x114   :  { %650 = vmatprep.subr.mxu1 %v365_v60 }
 0x115   :  { %651 = vmatpush3.msra.mxu1 %v365_v60 }
 0x116   :  { %652 = vmatprep.subr.mxu1 %v364_v4 }
 0x117   :  { %653 = vmatpush3.msra.mxu1 %v364_v4 }
 0x118   :  { %654 = vmatprep.subr.mxu1 %v363_v5 }
 0x119   :  { %655 = vmatpush3.msra.mxu1 %v363_v5 }
 0x11a   :  { %656 = vmatprep.subr.mxu1 %v362_v6 }
 0x11b   :  { %657 = vmatpush3.msra.mxu1 %v362_v6 }
 0x11c   :  { %658 = vmatprep.subr.mxu1 %v361_v7 }
 0x11d   :  { %659 = vmatpush3.msra.mxu1 %v361_v7 }
 0x1be   :  { %v592_v62 = vpop.f32.mrf.mxu1 }
 0x1bf   :  { %v253_v63 = vadd.f32 %v592_v62, %v472_v61 }
 0x1c0   :  { %v247_v0 = vpop.f32.mrf.mxu1 }
 0x1c1   :  { %v248_v1 = vadd.f32 %v472_v61, %v247_v0  ;;  %v257_v3 = vmax.f32 %v253_v63, 0.0 }
 0x1c3   :  { %v256_v2 = vmax.f32 %v248_v1, 0.0 }
 0x1c5   :  { %625 = vmatprep.mubr.f32.mxu0 %v256_v2 }
 0x1c6   :  { %626 = vmatmul.mubr.f32.vlgmr.msra.gmra.mxu0 %v257_v3 }
 0x286   :  { %v627_v9 = vpop.f32.mrf.mxu0 }
 0x287   :  { %v355_v10 = vadd.f32 %v627_v9, %v473_v8 }
 0x288   :  { %v349_v11 = vpop.f32.mrf.mxu0 }
 0x289   :  { %v350_v12 = vadd.f32 %v473_v8, %v349_v11  ;;  %v359_v14 = vmax.f32 %v355_v10, 0.0 }
 0x28b   :  { %v358_v13 = vmax.f32 %v350_v12, 0.0 }
 0x28d   :  { %660 = vmatprep.mubr.f32.mxu1 %v358_v13 }
 0x28e   :  { %661 = vmatmul.mubr.f32.vlgmr.msra.gmra.mxu1 %v359_v14 }
 0x34e   :  { %v662_v16 = vpop.f32.mrf.mxu1 }
 0x34f   :  { %v457_v17 = vadd.f32 %v662_v16, %v474_v15 }
 0x350   :  { %v451_v18 = vpop.f32.mrf.mxu1 }
 0x351   :  { %462 = vst.msk [vmem:[%s781_s3 + $0x8] sm:$0xff] %vm460_vm1, %v457_v17  ;;  %v452_v19 = vadd.f32 %v474_v15, %v451_v18 }
 0x353   :  { %461 = vst.msk [vmem:[%s781_s3] sm:$0xff] %vm460_vm1, %v452_v19 }
 0x354   :  { %467 = vsyncpa [#allocation3], 1 }
 0x355   :  { %468 = vsyncpa [#allocation5], 1 }

</bundles_post_ra>
